<compile_context>
chip_gen: v7x
topology: tpu7x:2x2x1
jax: 0.10.0
libtpu: 0.0.40
codegen_flags: <defaults>
</compile_context>

<pallas_src>
import functools

import jax
import jax.numpy as jnp
from jax.experimental import pallas as pl
from jax.experimental.pallas import tpu as pltpu


def head_kernel(x_ref, w_ref, o_ref, *, block_b, seq_len, head_size, padded_h,
                approx_recip):
    Bb, T, H, Hp = block_b, seq_len, head_size, padded_h

    # Fused QKV projection: one MXU pass with M = Bb*T rows, N = 3*Hp columns,
    # f32 accumulation.
    x2d = x_ref[...]                                            # (Bb*T, C)
    qkv = jnp.dot(x2d, w_ref[...],
                  preferred_element_type=jnp.float32)           # (Bb*T, 3*Hp) f32
    qkv = qkv.reshape(Bb, T, 3 * Hp)                            # rows mult. of 8 -> aligned

    # Each projection starts on a 128-lane boundary (0, Hp, 2*Hp): aligned slices,
    # no lane rotate.  1/sqrt(H) is already folded into the query weight.
    q = qkv[:, :, 0 * Hp:0 * Hp + H].astype(x2d.dtype)
    k = qkv[:, :, 1 * Hp:1 * Hp + H].astype(x2d.dtype)
    v = qkv[:, :, 2 * Hp:2 * Hp + H].astype(x2d.dtype)

    # Scores: contract on H directly (no materialized transpose of k).
    wei = jnp.einsum('bqh,bkh->bqk', q, k,
                     preferred_element_type=jnp.float32)        # (Bb, T, T) f32

    # Causal mask built in-kernel (cheap VPU compare/select hidden under MXU).
    row = jax.lax.broadcasted_iota(jnp.int32, (T, T), 0)
    col = jax.lax.broadcasted_iota(jnp.int32, (T, T), 1)
    wei = jnp.where((row >= col)[None, :, :], wei, -jnp.inf)

    # Numerically stable softmax in f32.  Every causal row has a finite
    # diagonal entry, so the row max is finite (no NaNs); this kernel is NOT
    # safe for fully-masked (padding-mask) rows.
    wei = wei - jnp.max(wei, axis=-1, keepdims=True)
    p = jnp.exp(wei)
    denom = jnp.sum(p, axis=-1, keepdims=True)
    if approx_recip:
        p = p * pl.reciprocal(denom, approx=True)               # EUP slot, frees VALU
    else:
        p = p / denom                                           # exact f32 path

    out = jnp.einsum('bqk,bkh->bqh', p.astype(v.dtype), v,
                     preferred_element_type=jnp.float32)        # (Bb, T, H) f32
    o_ref[...] = out.reshape(Bb * T, H).astype(o_ref.dtype)


def _vmem_limit_bytes():
    """Explicit VMEM limit: ~3/4 of physical, capped at 96 MiB (v5e/v6e 128 MiB,
    v7x 64 MiB physical)."""
    cap = 64 * 1024 * 1024
    try:
        info = pltpu.get_tpu_info()
        cap = int(getattr(info, "vmem_capacity_bytes", cap)) or cap
    except Exception:
        pass
    return int(min(cap * 3 // 4, 96 * 1024 * 1024))


def head_forward(x, w_key, w_query, w_value, *, compute_dtype=jnp.bfloat16,
                 block_b=None):
    """Causal single-head attention: softmax(mask(q k^T / sqrt(H))) @ v.

    x: (B, T, C); w_*: (C, H) stored so y = x @ W.  Returns (B, T, H) in
    x.dtype.  Matmul inputs are cast to `compute_dtype` (bf16 by default) with
    f32 accumulation; softmax stays f32.  compute_dtype=jnp.float32 gives exact
    f32 semantics (exact divide instead of approx reciprocal).
    """
    B, T, C = x.shape
    H = w_key.shape[1]
    out_dtype = x.dtype
    compute_dtype = jnp.dtype(compute_dtype)
    approx_recip = compute_dtype != jnp.dtype(jnp.float32)

    # Fused (C, 3*Hp) projection weight, order [q | k | v], each projection
    # zero-padded to a 128-lane boundary so in-kernel slices are vreg-aligned.
    # 1/sqrt(H) is folded into the query weight here (host-side, one-time).
    Hp = max(128, ((H + 127) // 128) * 128)

    def pad(w):
        return w if Hp == H else jnp.pad(w, ((0, 0), (0, Hp - H)))

    scale = jnp.asarray(H ** -0.5, dtype=w_query.dtype)
    w_qkv = jnp.concatenate(
        [pad(w_query * scale), pad(w_key), pad(w_value)], axis=1
    ).astype(compute_dtype)

    comp_sz = compute_dtype.itemsize
    out_sz = jnp.dtype(out_dtype).itemsize
    vmem_limit = _vmem_limit_bytes()
    budget = int(vmem_limit * 0.8)

    def step_bytes(bb):
        # Per-grid-step VMEM working set (double-buffered tiles + f32 intermediates).
        rows = bb * T
        x_b = 2 * rows * C * comp_sz                 # input tile, 2 buffers
        w_b = 2 * C * 3 * Hp * comp_sz               # fused weight (constant map)
        o_b = 2 * rows * H * out_sz                  # output tile, 2 buffers
        qkv_b = rows * 3 * Hp * 4                    # f32 projection
        qkv_c = rows * 3 * Hp * comp_sz              # casted q/k/v (upper bound)
        sc_b = bb * T * T * 4                        # f32 scores
        p_b = bb * T * T * comp_sz                   # casted probabilities
        ov_b = rows * H * 4                          # f32 PV output
        return x_b + w_b + o_b + qkv_b + qkv_c + sc_b + p_b + ov_b

    if block_b is None:
        if T % 8 == 0:
            divisors = [d for d in range(1, B + 1) if B % d == 0]
            cands = [d for d in divisors if step_bytes(d) <= budget] or [1]
            # Target 512-1024 rows per step; biggest candidate not exceeding it.
            target_rows = 1024
            under = [d for d in cands if d * T <= target_rows]
            block_b = max(under) if under else min(cands)
            # v7x megacore: keep >= 2 "parallel" grid steps when each step still
            # has a few hundred rows of work.
            if block_b == B and B > 1:
                half = [d for d in cands if d <= B // 2 and d * T >= 256]
                if half:
                    block_b = max(half)
        else:
            # T not a multiple of 8: use a single full block so the (rows, C)
            # block shape stays legal (in-kernel reshape may pay a relayout).
            block_b = B
    assert B % block_b == 0
    grid = (B // block_b,)

    # Lane-dense 2-D (B*T, C) input slab; output is a matching (B*T, H) slab.
    x2d = x.reshape(B * T, C).astype(compute_dtype)

    kernel = functools.partial(head_kernel, block_b=block_b, seq_len=T,
                               head_size=H, padded_h=Hp,
                               approx_recip=approx_recip)

    out2d = pl.pallas_call(
        kernel,
        out_shape=jax.ShapeDtypeStruct((B * T, H), out_dtype),
        grid=grid,
        in_specs=[
            pl.BlockSpec((block_b * T, C), lambda b: (b, 0)),    # rows of this batch block
            pl.BlockSpec((C, 3 * Hp), lambda b: (0, 0)),         # fused weight (resident)
        ],
        out_specs=pl.BlockSpec((block_b * T, H), lambda b: (b, 0)),
        compiler_params=pltpu.CompilerParams(
            dimension_semantics=("parallel",),
            vmem_limit_bytes=vmem_limit),
    )(x2d, w_qkv)
    return out2d.reshape(B, T, H)


def head_reference(x, w_key, w_query, w_value, *, compute_dtype=jnp.float32):
    """Pure-JAX reference mirroring the kernel's dtype handling (exact divide)."""
    d = jnp.dtype(compute_dtype)
    H = w_key.shape[1]
    xd = x.astype(d)
    wq = (w_query * (H ** -0.5)).astype(d)        # scale folded, same as kernel
    q = jnp.einsum('btc,ch->bth', xd, wq,
                   preferred_element_type=jnp.float32).astype(d)
    k = jnp.einsum('btc,ch->bth', xd, w_key.astype(d),
                   preferred_element_type=jnp.float32).astype(d)
    v = jnp.einsum('btc,ch->bth', xd, w_value.astype(d),
                   preferred_element_type=jnp.float32).astype(d)
    wei = jnp.einsum('bqh,bkh->bqk', q, k, preferred_element_type=jnp.float32)
    T = x.shape[1]
    tril = jnp.tril(jnp.ones((T, T), dtype=bool))
    wei = jnp.where(tril, wei, -jnp.inf)
    p = jax.nn.softmax(wei, axis=-1)
    out = jnp.einsum('bqk,bkh->bqh', p.astype(d), v,
                     preferred_element_type=jnp.float32)
    return out.astype(x.dtype)


if __name__ == "__main__":
    n_embd = 384
    head_size = 64

    key = jax.random.PRNGKey(0)
    kx, kk, kq, kv, kx2 = jax.random.split(key, 5)

    # Small shapes consistent with the module's forward.
    B, T = 2, 8
    x = jax.random.normal(kx, (B, T, n_embd), dtype=jnp.float32)
    # deterministic "nn.Linear(n_embd, head_size, bias=False)" weights,
    # stored transposed as (n_embd, head_size) so that y = x @ W
    w_key = jax.random.normal(kk, (n_embd, head_size), jnp.float32) * (n_embd ** -0.5)
    w_query = jax.random.normal(kq, (n_embd, head_size), jnp.float32) * (n_embd ** -0.5)
    w_value = jax.random.normal(kv, (n_embd, head_size), jnp.float32) * (n_embd ** -0.5)

    # Default fast path: bf16 matmul inputs, f32 accumulation / softmax.
    out = jax.block_until_ready(head_forward(x, w_key, w_query, w_value))
    ref = head_reference(x, w_key, w_query, w_value, compute_dtype=jnp.bfloat16)
    assert out.shape == (B, T, head_size)
    assert jnp.allclose(out, ref, atol=1e-2, rtol=1e-2)

    # Exact f32 path matches the PyTorch module's numerics tightly.
    out_f32 = jax.block_until_ready(
        head_forward(x, w_key, w_query, w_value, compute_dtype=jnp.float32))
    ref_f32 = head_reference(x, w_key, w_query, w_value, compute_dtype=jnp.float32)
    assert jnp.allclose(out_f32, ref_f32, atol=1e-4, rtol=1e-4)

    # A slightly larger case exercising the batch-blocking path.
    B2, T2 = 4, 32
    x2 = jax.random.normal(kx2, (B2, T2, n_embd), dtype=jnp.float32)
    out2 = jax.block_until_ready(head_forward(x2, w_key, w_query, w_value))
    ref2 = head_reference(x2, w_key, w_query, w_value, compute_dtype=jnp.bfloat16)
    assert out2.shape == (B2, T2, head_size)
    assert jnp.allclose(out2, ref2, atol=1e-2, rtol=1e-2)

    print("KERNEL_OK")
</pallas_src>

<mosaic_0001>
module attributes {stable_mosaic.version = 11 : i64} {
  func.func @head_kernel(%arg0: i32, %arg1: memref<16x384xbf16, #tpu.memory_space<vmem>>, %arg2: memref<384x384xbf16, #tpu.memory_space<vmem>>, %arg3: memref<16x64xf32, #tpu.memory_space<vmem>>) attributes {dimension_semantics = [#tpu.dimension_semantics<parallel>], iteration_bounds = array<i64: 1>, scalar_prefetch = 0 : i64, scratch_operands = 0 : i64, tpu.core_type = #tpu.core_type<tc>, window_params = [{transform_indices = @transform_0, window_bounds = array<i64: 16, 384>}, {pipeline_mode = #tpu.pipeline_mode<synchronous>, transform_indices = @transform_1, window_bounds = array<i64: 384, 384>}, {transform_indices = @transform_2, window_bounds = array<i64: 16, 64>}]} {
    %c0 = arith.constant 0 : index
    %c0_0 = arith.constant 0 : index
    %0 = vector.load %arg1[%c0, %c0_0] : memref<16x384xbf16, #tpu.memory_space<vmem>>, vector<16x384xbf16>
    %c0_1 = arith.constant 0 : index
    %c0_2 = arith.constant 0 : index
    %1 = vector.load %arg2[%c0_1, %c0_2] : memref<384x384xbf16, #tpu.memory_space<vmem>>, vector<384x384xbf16>
    %cst = arith.constant dense<0.000000e+00> : vector<16x384xf32>
    %2 = tpu.matmul %0, %1, %cst {dimension_numbers = #tpu.dot_dimension_numbers<[1], [0], [0], [1], [0, 0, 1, 1], [], []>} : vector<16x384xbf16>, vector<384x384xbf16>, vector<16x384xf32> -> vector<16x384xf32>
    %3 = vector.shape_cast %2 : vector<16x384xf32> to vector<2x8x384xf32>
    %4 = vector.extract_strided_slice %3 {offsets = [0, 0, 0], sizes = [2, 8, 64], strides = [1, 1, 1]} : vector<2x8x384xf32> to vector<2x8x64xf32>
    %5 = arith.truncf %4 : vector<2x8x64xf32> to vector<2x8x64xbf16>
    %6 = vector.extract_strided_slice %3 {offsets = [0, 0, 128], sizes = [2, 8, 64], strides = [1, 1, 1]} : vector<2x8x384xf32> to vector<2x8x64xf32>
    %7 = arith.truncf %6 : vector<2x8x64xf32> to vector<2x8x64xbf16>
    %8 = vector.extract_strided_slice %3 {offsets = [0, 0, 256], sizes = [2, 8, 64], strides = [1, 1, 1]} : vector<2x8x384xf32> to vector<2x8x64xf32>
    %9 = arith.truncf %8 : vector<2x8x64xf32> to vector<2x8x64xbf16>
    "tpu.trace_start"() <{level = 10 : i32, message = "bqh,bkh->bqk"}> : () -> ()
    %cst_3 = arith.constant dense<0.000000e+00> : vector<2x8x8xf32>
    %10 = tpu.matmul %5, %7, %cst_3 {dimension_numbers = #tpu.dot_dimension_numbers<[2], [2], [1], [1], [0, 0, 0, 1, 1, 1], [0], [0]>} : vector<2x8x64xbf16>, vector<2x8x64xbf16>, vector<2x8x8xf32> -> vector<2x8x8xf32>
    "tpu.trace_stop"() : () -> ()
    %11 = tpu.iota {dimensions = array<i32: 0>} : vector<8x8xi32>
    %12 = tpu.iota {dimensions = array<i32: 1>} : vector<8x8xi32>
    %13 = arith.cmpi sge, %11, %12 : vector<8x8xi32>
    %14 = vector.shape_cast %13 : vector<8x8xi1> to vector<1x8x8xi1>
    %cst_4 = arith.constant 0xFF800000 : f32
    %15 = vector.shape_cast %14 : vector<1x8x8xi1> to vector<1x8x8xi1>
    %16 = vector.broadcast %15 : vector<1x8x8xi1> to vector<2x8x8xi1>
    %17 = vector.broadcast %cst_4 : f32 to vector<2x8x8xf32>
    %18 = arith.select %16, %10, %17 : vector<2x8x8xi1>, vector<2x8x8xf32>
    %cst_5 = arith.constant dense<0xFF800000> : vector<2x8xf32>
    %19 = vector.multi_reduction <maximumf>, %18, %cst_5 [2] : vector<2x8x8xf32> to vector<2x8xf32>
    %20 = vector.shape_cast %19 : vector<2x8xf32> to vector<2x8x1xf32>
    %21 = vector.broadcast %20 : vector<2x8x1xf32> to vector<2x8x8xf32>
    %22 = arith.subf %18, %21 : vector<2x8x8xf32>
    %23 = math.exp %22 : vector<2x8x8xf32>
    %cst_6 = arith.constant dense<0.000000e+00> : vector<2x8xf32>
    %24 = vector.multi_reduction <add>, %23, %cst_6 [2] : vector<2x8x8xf32> to vector<2x8xf32>
    %25 = vector.shape_cast %24 : vector<2x8xf32> to vector<2x8x1xf32>
    %26 = tpu.reciprocal %25 {approx = true} : vector<2x8x1xf32> -> vector<2x8x1xf32>
    %27 = vector.broadcast %26 : vector<2x8x1xf32> to vector<2x8x8xf32>
    %28 = arith.mulf %23, %27 : vector<2x8x8xf32>
    %29 = arith.truncf %28 : vector<2x8x8xf32> to vector<2x8x8xbf16>
    "tpu.trace_start"() <{level = 10 : i32, message = "bqk,bkh->bqh"}> : () -> ()
    %cst_7 = arith.constant dense<0.000000e+00> : vector<2x8x64xf32>
    %30 = tpu.matmul %29, %9, %cst_7 {dimension_numbers = #tpu.dot_dimension_numbers<[2], [1], [1], [2], [0, 0, 0, 1, 1, 2], [0], [0]>} : vector<2x8x8xbf16>, vector<2x8x64xbf16>, vector<2x8x64xf32> -> vector<2x8x64xf32>
    "tpu.trace_stop"() : () -> ()
    %31 = vector.shape_cast %30 : vector<2x8x64xf32> to vector<16x64xf32>
    %c0_8 = arith.constant 0 : index
    %c0_9 = arith.constant 0 : index
    %32 = vector.load %arg3[%c0_8, %c0_9] : memref<16x64xf32, #tpu.memory_space<vmem>>, vector<16x64xf32>
    tpu.vector_store %arg3[%c0_8, %c0_9], %31 {strides = array<i32>} : memref<16x64xf32, #tpu.memory_space<vmem>>, vector<16x64xf32>,
    return
  }
  func.func @transform_0(%arg0: i32) -> (i32, i32) {
    %c0_i32 = arith.constant 0 : i32
    %c0_i32_0 = arith.constant 0 : i32
    return %arg0, %c0_i32 : i32, i32
  }
  func.func @transform_1(%arg0: i32) -> (i32, i32) {
    %c0_i32 = arith.constant 0 : i32
    %c0_i32_0 = arith.constant 0 : i32
    %c0_i32_1 = arith.constant 0 : i32
    return %c0_i32, %c0_i32_0 : i32, i32
  }
  func.func @transform_2(%arg0: i32) -> (i32, i32) {
    %c0_i32 = arith.constant 0 : i32
    %c0_i32_0 = arith.constant 0 : i32
    return %arg0, %c0_i32 : i32, i32
  }
}

</mosaic_0001>

<bundles_post_ra>
// kernel: tpu_custom_call.1
= control target key start
LH: loop header
LB: loop body
LE: loop exit
PB: predicated region body
PF: predicated region fallthrough
CT: control target
= control target key end

     0   :  { %7 = vsyncpa [#allocation3], 0  ;;  %s1406_s0 = inlined_call_operand.hbm [shape: bf16[16,384], index: 0, kind: input, shape index: {}]   ;;  %s1407_s1 = inlined_call_operand.hbm [shape: bf16[384,384], index: 1, kind: input, shape index: {}]   ;;  %s1408_s2 = inlined_call_operand.hbm [shape: f32[16,64], index: 2, kind: output, shape index: {}]  }
   0x1   :  { %8 = vsyncpa [#allocation6], 0 }
   0x2   :  { %9 = vsyncpa [#allocation4], 0  ;;  %s1311_s9 = smov [#allocation2]   ;;  %s1239_s13 = scalar_lea.hbm %s1406_s0, 384 }
   0x3   :  { %s15_s10 = sshll.u32 %s1311_s9, 4  ;;  %p1240_p0 = scmp.ne.s32.totalorder %s1406_s0, %s1239_s13  ;;  %s16_s10 = int_to_ptr.vmem [resolvable:$true] %s15_s10 }
   0x4   :  { %p1243_p1 = scmp.lt.u32.totalorder %s1239_s13, %s1406_s0 }
   0x6   :  { %p1245_p2 = pnand %p1243_p1, %p1240_p0 }
   0x8   :  { %1248 = shalt.err (!%p1245_p2)
}
   0x9   :  { %s1249_s18 = scalar_lea.vmem %s16_s10, 384  ;;  %p1254_p4 = scmp.lt.s32.totalorder %s16_s10, %s16_s10 }
   0xa   :  { %p1250_p3 = scmp.ne.s32.totalorder %s16_s10, %s1249_s18  ;;  %p1255_p5 = scmp.lt.s32.totalorder %s1249_s18, %s1249_s18 }
   0xc   :  { %p1256_p6 = por %p1255_p5, %p1254_p4 }
   0xe   :  { %p1257_p7 = pnand %p1256_p6, %p1250_p3 }
  0x10   :  { %1260 = shalt.err (!%p1257_p7)
}
  0x11   :  { %s1312_s19 = smov 192   ;;  %s1313_s20 = smov 12  }
  0x12   :  { %21 = dma.hbm_to_vmem [thread:$0]  %s1406_s0, 384, %s16_s10, [#allocation3], %s1312_s19, %s1312_s19, %s1313_s20  }
  0x13   :  { %s1314_s23 = smov [#allocation5]   ;;  %s1261_s27 = scalar_lea.hbm %s1407_s1, 9216 }
  0x14   :  { %s27_s24 = sshll.u32 %s1314_s23, 4  ;;  %p1262_p8 = scmp.ne.s32.totalorder %s1407_s1, %s1261_s27  ;;  %s28_s24 = int_to_ptr.vmem [resolvable:$true] %s27_s24 }
  0x15   :  { %p1265_p9 = scmp.lt.u32.totalorder %s1261_s27, %s1407_s1 }
  0x17   :  { %p1267_p10 = pnand %p1265_p9, %p1262_p8 }
  0x19   :  { %1270 = shalt.err (!%p1267_p10)
}
  0x1a   :  { %s1271_s4 = scalar_lea.vmem %s28_s24, 9216  ;;  %p1276_p12 = scmp.lt.s32.totalorder %s28_s24, %s28_s24 }
  0x1b   :  { %p1272_p11 = scmp.ne.s32.totalorder %s28_s24, %s1271_s4  ;;  %p1277_p13 = scmp.lt.s32.totalorder %s1271_s4, %s1271_s4 }
  0x1d   :  { %p1278_p0 = por %p1277_p13, %p1276_p12 }
  0x1f   :  { %p1279_p1 = pnand %p1278_p0, %p1272_p11 }
  0x21   :  { %1282 = shalt.err (!%p1279_p1)
}
  0x22   :  { %33 = dma.hbm_to_vmem [thread:$0]  %s1407_s1, 9216, %s28_s24, [#allocation6], %s1312_s19, %s1312_s19, %s1313_s20  }
  0x23   :  { %1305 = dma.done.wait [#allocation3], 384  }
  0x24   :  { %1306 = vsyncadd [#allocation3], 4294966912 }
  0x25   :  { %1307 = dma.done.wait [#allocation6], 9216  }
  0x26   :  { %1308 = vsyncadd [#allocation6], 4294958080  ;;  %v1131_v0 = vld [vmem:[#allocation5 + $0x4] ss:$12 sps:$4 sm:$0xff]   ;;  %v1133_v1 = vld [vmem:[#allocation5] ss:$12 sps:$4 sm:$0xff]  }
  0x27   :  { %541 = vmatprep.subr.bf16.mxu0 %v1131_v0  ;;  %v1134_v2 = vld [vmem:[#allocation5 + $0x1c] ss:$12 sps:$4 sm:$0xff]   ;;  %v1136_v3 = vld [vmem:[#allocation5 + $0x18] ss:$12 sps:$4 sm:$0xff]   ;;  %v1137_v4 = vld [vmem:[#allocation5 + $0x34] ss:$12 sps:$4 sm:$0xff]  }
  0x28   :  { %542 = vmatpush1.bf16.msra.mxu0 %v1133_v1  ;;  %v1139_v5 = vld [vmem:[#allocation5 + $0x30] ss:$12 sps:$4 sm:$0xff]   ;;  %v1140_v6 = vld [vmem:[#allocation5 + $0x4c] ss:$12 sps:$4 sm:$0xff]   ;;  %v1142_v7 = vld [vmem:[#allocation5 + $0x48] ss:$12 sps:$4 sm:$0xff]  }
  0x29   :  { %543 = vmatprep.subr.bf16.mxu0 %v1134_v2  ;;  %v1143_v8 = vld [vmem:[#allocation5 + $0x64] ss:$12 sps:$4 sm:$0xff]   ;;  %v1145_v9 = vld [vmem:[#allocation5 + $0x60] ss:$12 sps:$4 sm:$0xff]   ;;  %v1146_v10 = vld [vmem:[#allocation5 + $0x7c] ss:$12 sps:$4 sm:$0xff]  }
  0x2a   :  { %v1148_v11 = vld [vmem:[#allocation5 + $0x78] ss:$12 sps:$4 sm:$0xff]   ;;  %v1149_v12 = vld [vmem:[#allocation5 + $0x94] ss:$12 sps:$4 sm:$0xff]   ;;  %v1151_v14 = vld [vmem:[#allocation5 + $0x90] ss:$12 sps:$4 sm:$0xff]  }
  0x2b   :  { %v1181_v13 = vld [vmem:[#allocation2 + $0x4] ss:$12 sps:$4 sm:$0xff]   ;;  %v1154_v16 = vld [vmem:[#allocation5 + $0xa8] ss:$12 sps:$4 sm:$0xff]   ;;  %v1155_v17 = vld [vmem:[#allocation5 + $0xc4] ss:$12 sps:$4 sm:$0xff]  }
  0x2c   :  { %544 = vmatpush1.bf16.msra.mxu0 %v1136_v3  ;;  %v1152_v15 = vld [vmem:[#allocation5 + $0xac] ss:$12 sps:$4 sm:$0xff]   ;;  %573 = vmatprep.mubr.bf16.mxu0 %v1181_v13  ;;  %v1158_v19 = vld [vmem:[#allocation5 + $0xdc] ss:$12 sps:$4 sm:$0xff]   ;;  %v1161_v21 = vld [vmem:[#allocation5 + $0xf4] ss:$12 sps:$4 sm:$0xff]  }
  0x2d   :  { %545 = vmatprep.subr.bf16.mxu0 %v1137_v4  ;;  %659 = vmatprep.mubr.bf16.mxu1 %v1181_v13  ;;  %v1157_v18 = vld [vmem:[#allocation5 + $0xc0] ss:$12 sps:$4 sm:$0xff]   ;;  %v1160_v20 = vld [vmem:[#allocation5 + $0xd8] ss:$12 sps:$4 sm:$0xff]   ;;  %v1207_v22 = vld [vmem:[#allocation5 + $0xc8] ss:$12 sps:$4 sm:$0xff]  }
  0x2e   :  { %v1208_v23 = vld [vmem:[#allocation5 + $0x8] ss:$12 sps:$4 sm:$0xff]   ;;  %v1163_v24 = vld [vmem:[#allocation5 + $0xf0] ss:$12 sps:$4 sm:$0xff]   ;;  %1034 = vmatprep.subr.bf16.mxu1 %v1207_v22  ;;  %v1209_v25 = vld [vmem:[#allocation5 + $0xe0] ss:$12 sps:$4 sm:$0xff]  }
  0x2f   :  { %1035 = vmatpush3.bf16.msra.mxu1 %v1208_v23  ;;  %v1210_v26 = vld [vmem:[#allocation5 + $0x20] ss:$12 sps:$4 sm:$0xff]   ;;  %v1211_v27 = vld [vmem:[#allocation5 + $0xf8] ss:$12 sps:$4 sm:$0xff]   ;;  %v1166_v29 = vld [vmem:[#allocation5 + $0x108] ss:$12 sps:$4 sm:$0xff]  }
  0x30   :  { %546 = vmatpush1.bf16.msra.mxu0 %v1139_v5  ;;  %1036 = vmatprep.subr.bf16.mxu1 %v1209_v25  ;;  %v1164_v28 = vld [vmem:[#allocation5 + $0x10c] ss:$12 sps:$4 sm:$0xff]   ;;  %v1213_v31 = vld [vmem:[#allocation5 + $0x110] ss:$12 sps:$4 sm:$0xff]   ;;  %v1215_v35 = vld [vmem:[#allocation5 + $0x128] ss:$12 sps:$4 sm:$0xff]  }
  0x31   :  { %547 = vmatprep.subr.bf16.mxu0 %v1140_v6  ;;  %v1212_v30 = vld [vmem:[#allocation5 + $0x38] ss:$12 sps:$4 sm:$0xff]   ;;  %v1169_v33 = vld [vmem:[#allocation5 + $0x120] ss:$12 sps:$4 sm:$0xff]   ;;  %v1214_v34 = vld [vmem:[#allocation5 + $0x50] ss:$12 sps:$4 sm:$0xff]  }
  0x32   :  { %v1167_v32 = vld [vmem:[#allocation5 + $0x124] ss:$12 sps:$4 sm:$0xff]   ;;  %v1170_v36 = vld [vmem:[#allocation5 + $0x13c] ss:$12 sps:$4 sm:$0xff]   ;;  %v1217_v39 = vld [vmem:[#allocation5 + $0x140] ss:$12 sps:$4 sm:$0xff]  }
  0x33   :  { %1037 = vmatpush3.bf16.msra.mxu1 %v1210_v26  ;;  %v1172_v37 = vld [vmem:[#allocation5 + $0x138] ss:$12 sps:$4 sm:$0xff]   ;;  %v1216_v38 = vld [vmem:[#allocation5 + $0x68] ss:$12 sps:$4 sm:$0xff]   ;;  %v1175_v41 = vld [vmem:[#allocation5 + $0x150] ss:$12 sps:$4 sm:$0xff]  }
  0x34   :  { %548 = vmatpush1.bf16.msra.mxu0 %v1142_v7  ;;  %1038 = vmatprep.subr.bf16.mxu1 %v1211_v27  ;;  %v1173_v40 = vld [vmem:[#allocation5 + $0x154] ss:$12 sps:$4 sm:$0xff]   ;;  %v1219_v43 = vld [vmem:[#allocation5 + $0x158] ss:$12 sps:$4 sm:$0xff]   ;;  %v1221_v47 = vld [vmem:[#allocation5 + $0x170] ss:$12 sps:$4 sm:$0xff]  }
  0x35   :  { %549 = vmatprep.subr.bf16.mxu0 %v1143_v8  ;;  %v1218_v42 = vld [vmem:[#allocation5 + $0x80] ss:$12 sps:$4 sm:$0xff]   ;;  %v1220_v45 = vld [vmem:[#allocation5 + $0x98] ss:$12 sps:$4 sm:$0xff]   ;;  %v1178_v46 = vld [vmem:[#allocation5 + $0x168] ss:$12 sps:$4 sm:$0xff]  }
  0x36   :  { %v1176_v44 = vld [vmem:[#allocation5 + $0x16c] ss:$12 sps:$4 sm:$0xff]   ;;  %v1184_v48 = vld [vmem:[#allocation5 + $0x184] ss:$12 sps:$4 sm:$0xff]   ;;  %v1179_v49 = vld [vmem:[#allocation2] ss:$12 sps:$4 sm:$0xff]  }
  0x37   :  { %1039 = vmatpush3.bf16.msra.mxu1 %v1212_v30  ;;  %v1222_v50 = vld [vmem:[#allocation5 + $0xb0] ss:$12 sps:$4 sm:$0xff]   ;;  %v1182_v51 = vld [vmem:[#allocation5 + $0x180] ss:$12 sps:$4 sm:$0xff]   ;;  %v1223_v53 = vld [vmem:[#allocation5 + $0x188] ss:$12 sps:$4 sm:$0xff]  }
  0x38   :  { %550 = vmatpush1.bf16.msra.mxu0 %v1145_v9  ;;  %1040 = vmatprep.subr.bf16.mxu1 %v1213_v31  ;;  %v1187_v52 = vld [vmem:[#allocation5 + $0x19c] ss:$12 sps:$4 sm:$0xff]   ;;  %v1185_v54 = vld [vmem:[#allocation5 + $0x198] ss:$12 sps:$4 sm:$0xff]   ;;  %v1315_v55 = vmov 0   ;;  %v1316_v57 = vmov 0.0  }
  0x39   :  { %551 = vmatprep.subr.bf16.mxu0 %v1146_v10  ;;  %v1190_v56 = vld [vmem:[#allocation5 + $0x1b4] ss:$12 sps:$4 sm:$0xff]   ;;  %vm1317_vm0 = vmmov 0   ;;  %v1188_v59 = vld [vmem:[#allocation5 + $0x1b0] ss:$12 sps:$4 sm:$0xff]   ;;  %vm715_vm1 = vcmask 523264  }
  0x3a   :  { %v1224_v58 = vld [vmem:[#allocation5 + $0x1a0] ss:$12 sps:$4 sm:$0xff]   ;;  %v1225_v61 = vld [vmem:[#allocation5 + $0x1b8] ss:$12 sps:$4 sm:$0xff]   ;;  %v1191_v62 = vld [vmem:[#allocation5 + $0x1c8] ss:$12 sps:$4 sm:$0xff]  }
  0x3b   :  { %1041 = vmatpush3.bf16.msra.mxu1 %v1214_v34  ;;  %v1193_v60 = vld [vmem:[#allocation5 + $0x1cc] ss:$12 sps:$4 sm:$0xff]   ;;  %v1196_v63 = vld [vmem:[#allocation5 + $0x1e4] ss:$12 sps:$4 sm:$0xff]   ;;  %v1199_v2 = vld [vmem:[#allocation5 + $0x1fc] ss:$12 sps:$4 sm:$0xff]  }
  0x3c   :  { %552 = vmatpush1.bf16.msra.mxu0 %v1148_v11  ;;  %1042 = vmatprep.subr.bf16.mxu1 %v1215_v35  ;;  %v1226_v0 = vld [vmem:[#allocation5 + $0x1d0] ss:$12 sps:$4 sm:$0xff]   ;;  %v1194_v1 = vld [vmem:[#allocation5 + $0x1e0] ss:$12 sps:$4 sm:$0xff]   ;;  %v1227_v3 = vld [vmem:[#allocation5 + $0x1e8] ss:$12 sps:$4 sm:$0xff]  }
  0x3d   :  { %553 = vmatprep.subr.bf16.mxu0 %v1149_v12  ;;  %v1197_v4 = vld [vmem:[#allocation5 + $0x1f8] ss:$12 sps:$4 sm:$0xff]   ;;  %v1202_v5 = vld [vmem:[#allocation5 + $0x214] ss:$12 sps:$4 sm:$0xff]   ;;  %v1200_v7 = vld [vmem:[#allocation5 + $0x210] ss:$12 sps:$4 sm:$0xff]  }
  0x3e   :  { %v1228_v6 = vld [vmem:[#allocation5 + $0x200] ss:$12 sps:$4 sm:$0xff]   ;;  %v1229_v9 = vld [vmem:[#allocation5 + $0x218] ss:$12 sps:$4 sm:$0xff]   ;;  %v1203_v10 = vld [vmem:[#allocation5 + $0x228] ss:$12 sps:$4 sm:$0xff]  }
  0x3f   :  { %1043 = vmatpush3.bf16.msra.mxu1 %v1216_v38  ;;  %v1205_v8 = vld [vmem:[#allocation5 + $0x22c] ss:$12 sps:$4 sm:$0xff]   ;;  %v1206_v11 = vld [vmem:[#allocation2 + $0x8] ss:$12 sps:$4 sm:$0xff]   ;;  %vm845_vm2 = vcmask 1043456   ;;  %vm817_vm4 = vcmask 64512  }
  0x40   :  { %554 = vmatpush1.bf16.msra.mxu0 %v1151_v14  ;;  %1044 = vmatprep.subr.bf16.mxu1 %v1217_v39  ;;  %v1230_v12 = vld [vmem:[#allocation5 + $0x230] ss:$12 sps:$4 sm:$0xff]   ;;  %v808_v39 = vlaneseq  ;;  %s1318_s1 = smov [#allocation7]  }
  0x41   :  { %555 = vmatprep.subr.bf16.mxu0 %v1152_v15  ;;  %s942_s6 = sshll.u32 %s1318_s1, 4  ;;  %s943_s6 = int_to_ptr.vmem [resolvable:$true] %s942_s6 }
  0x42   :  { %s1283_s7 = scalar_lea.vmem %s943_s6, 256  ;;  %p1288_p3 = scmp.lt.s32.totalorder %s943_s6, %s943_s6 }
  0x43   :  { %1045 = vmatpush3.bf16.msra.mxu1 %v1218_v42  ;;  %p1284_p2 = scmp.ne.s32.totalorder %s943_s6, %s1283_s7  ;;  %p1289_p4 = scmp.lt.s32.totalorder %s1283_s7, %s1283_s7 }
  0x44   :  { %556 = vmatpush1.bf16.msra.mxu0 %v1154_v16  ;;  %1046 = vmatprep.subr.bf16.mxu1 %v1219_v43 }
  0x45   :  { %557 = vmatprep.subr.bf16.mxu0 %v1155_v17  ;;  %p1290_p5 = por %p1289_p4, %p1288_p3 }
  0x47   :  { %1047 = vmatpush3.bf16.msra.mxu1 %v1220_v45  ;;  %p1291_p6 = pnand %p1290_p5, %p1284_p2 }
  0x48   :  { %558 = vmatpush1.bf16.msra.mxu0 %v1157_v18  ;;  %1048 = vmatprep.subr.bf16.mxu1 %v1221_v47 }
  0x49   :  { %559 = vmatprep.subr.bf16.mxu0 %v1158_v19 }
  0x4b   :  { %1049 = vmatpush3.bf16.msra.mxu1 %v1222_v50 }
  0x4c   :  { %560 = vmatpush1.bf16.msra.mxu0 %v1160_v20  ;;  %1073 = vmatprep.subr.bf16.mxu1 %v1316_v57 }
  0x4d   :  { %561 = vmatprep.subr.bf16.mxu0 %v1161_v21 }
  0x4e   :  { %660 = vmatmul.mubr.bf16.vlgmr.msra.gmra.mrb[0].mxu1 %v1179_v49 }
  0x4f   :  { %1074 = vmatpush3.bf16.msra.mxu1 %v1223_v53  ;;  %1089 = vmatprep.mubr.msk.bf16.mxu1 %vm1317_vm0, %v1316_v57 }
  0x50   :  { %562 = vmatpush1.bf16.msra.mxu0 %v1163_v24  ;;  %1075 = vmatprep.subr.bf16.mxu1 %v1316_v57 }
  0x51   :  { %563 = vmatprep.subr.bf16.mxu0 %v1164_v28 }
  0x53   :  { %1076 = vmatpush3.bf16.msra.mxu1 %v1224_v58 }
  0x54   :  { %564 = vmatpush1.bf16.msra.mxu0 %v1166_v29  ;;  %1077 = vmatprep.subr.bf16.mxu1 %v1316_v57 }
  0x55   :  { %565 = vmatprep.subr.bf16.mxu0 %v1167_v32 }
  0x57   :  { %1078 = vmatpush3.bf16.msra.mxu1 %v1225_v61 }
  0x58   :  { %566 = vmatpush1.bf16.msra.mxu0 %v1169_v33  ;;  %1079 = vmatprep.subr.bf16.mxu1 %v1316_v57 }
  0x59   :  { %567 = vmatprep.subr.bf16.mxu0 %v1170_v36 }
  0x5b   :  { %1080 = vmatpush3.bf16.msra.mxu1 %v1226_v0 }
  0x5c   :  { %568 = vmatpush1.bf16.msra.mxu0 %v1172_v37  ;;  %1081 = vmatprep.subr.bf16.mxu1 %v1316_v57 }
  0x5d   :  { %569 = vmatprep.subr.bf16.mxu0 %v1173_v40  ;;  %v809_v40 = vshrl.u32 %v808_v39, 7 }
  0x5f   :  { %1082 = vmatpush3.bf16.msra.mxu1 %v1227_v3 }
  0x60   :  { %570 = vmatpush1.bf16.msra.mxu0 %v1175_v41  ;;  %1083 = vmatprep.subr.bf16.mxu1 %v1316_v57  ;;  %v811_v41 = vand.u32 127, %v808_v39 }
  0x61   :  { %571 = vmatprep.subr.bf16.mxu0 %v1176_v44 }
  0x62   :  { %vm812_vm3 = vcmp.ge.s32.totalorder %v809_v40, %v811_v41 }
  0x63   :  { %1084 = vmatpush3.bf16.msra.mxu1 %v1228_v6 }
  0x64   :  { %572 = vmatpush1.bf16.msra.mxu0 %v1178_v46  ;;  %1085 = vmatprep.subr.bf16.mxu1 %v1316_v57 }
  0x65   :  { %584 = vmatprep.subr.bf16.mxu0 %v1184_v48 }
  0x67   :  { %574 = vmatmul.mubr.bf16.vlgmr.msra.gmra.mrb[0].mxu0 %v1179_v49  ;;  %1086 = vmatpush3.bf16.msra.mxu1 %v1229_v9 }
  0x68   :  { %585 = vmatpush1.bf16.msra.mxu0 %v1182_v51  ;;  %616 = vmatprep.mubr.bf16.mxu0 %v1315_v55 }
  0x69   :  { %586 = vmatprep.subr.bf16.mxu0 %v1187_v52  ;;  %1087 = vmatprep.subr.bf16.mxu1 %v1316_v57 }
  0x6b   :  { %1088 = vmatpush3.bf16.msra.mxu1 %v1230_v12 }
  0x6c   :  { %587 = vmatpush1.bf16.msra.mxu0 %v1185_v54  ;;  %1093 = vmatprep.subr.bf16.mxu1 %v1316_v57 }
  0x6d   :  { %588 = vmatprep.subr.bf16.mxu0 %v1190_v56 }
  0x6e   :  { %1090 = vmatmul.mubr.bf16.vlgmr.msra.gmra.mrb[4].mxu1 %v1206_v11 }
  0x6f   :  { %1095 = vmatprep.mubr.msk.bf16.mxu1 %vm1317_vm0, %v1316_v57 }
  0x70   :  { %589 = vmatpush1.bf16.msra.mxu0 %v1188_v59 }
  0x71   :  { %590 = vmatprep.subr.bf16.mxu0 %v1193_v60 }
  0x74   :  { %591 = vmatpush1.bf16.msra.mxu0 %v1191_v62 }
  0x75   :  { %592 = vmatprep.subr.bf16.mxu0 %v1196_v63 }
  0x78   :  { %593 = vmatpush1.bf16.msra.mxu0 %v1194_v1 }
  0x79   :  { %594 = vmatprep.subr.bf16.mxu0 %v1199_v2 }
  0x7c   :  { %595 = vmatpush1.bf16.msra.mxu0 %v1197_v4 }
  0x7d   :  { %596 = vmatprep.subr.bf16.mxu0 %v1202_v5 }
  0x80   :  { %597 = vmatpush1.bf16.msra.mxu0 %v1200_v7 }
  0x81   :  { %598 = vmatprep.subr.bf16.mxu0 %v1205_v8 }
  0x84   :  { %599 = vmatpush1.bf16.msra.mxu0 %v1203_v10 }
  0x87   :  { %617 = vmatmul.mubr.bf16.vlgmr.msra.gmra.mrb[0].mxu0 %v1206_v11 }
 0x121   :  { %v1050_v13 = vpop.f32.mrb[0].mxu1 }
 0x122   :  { %v1051_v14 = vpop.f32.mrb[1].mxu1 }
 0x123   :  { %v1052_v15 = vadd.f32 %v1051_v14, %v1050_v13  ;;  %v1053_v16 = vpop.f32.mrb[2].mxu1 }
 0x124   :  { %v1054_v17 = vpop.f32.mrb[3].mxu1 }
 0x125   :  { %v1055_v18 = vadd.f32 %v1054_v17, %v1053_v16 }
 0x141   :  { %v702_v24 = vpop.f32.mrb[4].mxu1 }
 0x142   :  { %v703_v26 = vadd.f32 %v1052_v15, %v702_v24  ;;  %v1091_v27 = vpop.f32.mrb[5].mxu1 }
 0x143   :  { %v705_v28 = vpop.f32.mrb[6].mxu1 }
 0x144   :  { %v706_v29 = vadd.f32 %v1055_v18, %v705_v28  ;;  %v1092_v30 = vpop.f32.mrb[7].mxu1  ;;  %v713_v36 = vpack.c.bf16 %v703_v26, %v703_v26 }
 0x146   :  { %v714_v32 = vpack.c.bf16 %v706_v29, %v706_v29  ;;  %v847_v38 = vsel %vm845_vm2, %v713_v36, 0 }
 0x148   :  { %v893_v34 = vsel %vm845_vm2, %v714_v32, 0 }
 0x15a   :  { %v618_v19 = vpop.f32.mrb[0].mxu0 }
 0x15b   :  { %v620_v20 = vpop.f32.mrb[1].mxu0  ;;  %v709_v33 = vpack.c.bf16 %v618_v19, %v618_v19 }
 0x15c   :  { %v711_v21 = vpack.c.bf16 %v620_v20, %v620_v20  ;;  %v622_v22 = vpop.f32.mrb[2].mxu0 }
 0x15d   :  { %v624_v23 = vpop.f32.mrb[3].mxu0  ;;  %v710_v37 = vpack.c.bf16 %v622_v22, %v622_v22 }
 0x15e   :  { %v720_v25 = vsel %vm715_vm1, %v711_v21, 0  ;;  %v712_v31 = vpack.c.bf16 %v624_v23, %v624_v23 }
 0x15f   :  { %1094 = vmatpush3.bf16.xpose.msra.mxu1 %v720_v25 }
 0x160   :  { %1099 = vmatprep.subr.bf16.mxu1 %v1316_v57  ;;  %v766_v35 = vsel %vm715_vm1, %v712_v31, 0 }
 0x166   :  { %1096 = vmatmul.mubr.msk.bf16.vlgmr.msra.gmra.mrb[8].mxu1 %vm715_vm1, %v709_v33 }
 0x167   :  { %1100 = vmatpush3.bf16.xpose.msra.mxu1 %v766_v35  ;;  %1101 = vmatprep.mubr.msk.bf16.mxu1 %vm1317_vm0, %v1316_v57 }
 0x168   :  { %1105 = vmatprep.subr.bf16.mxu1 %v1316_v57 }
 0x16e   :  { %1102 = vmatmul.mubr.msk.bf16.vlgmr.msra.gmra.mrb[12].mxu1 %vm715_vm1, %v710_v37 }
 0x16f   :  { %1106 = vmatpush3.bf16.msra.mxu1 %v847_v38  ;;  %1107 = vmatprep.mubr.msk.bf16.mxu1 %vm1317_vm0, %v1316_v57 }
 0x170   :  { %1111 = vmatprep.subr.bf16.mxu1 %v1316_v57 }
 0x239   :  { %v756_v42 = vpop.f32.mrb[8].mxu1 }
 0x23a   :  { %v815_v43 = vsel %vm812_vm3, %v756_v42, -inf  ;;  %v1097_v44 = vpop.f32.mrb[9].mxu1 }
 0x23b   :  { %v759_v45 = vpop.f32.mrb[10].mxu1  ;;  %v818_v46 = vsel %vm817_vm4, %v815_v43, -inf }
 0x23c   :  { %819 = vmax.xlane.f32.xlu0 %v818_v46  ;;  %v1098_v47 = vpop.f32.mrb[11].mxu1 }
 0x241   :  { %v802_v48 = vpop.f32.mrb[12].mxu1 }
 0x242   :  { %v816_v49 = vsel %vm812_vm3, %v802_v48, -inf  ;;  %v1103_v50 = vpop.f32.mrb[13].mxu1 }
 0x243   :  { %v805_v51 = vpop.f32.mrb[14].mxu1  ;;  %v821_v52 = vsel %vm817_vm4, %v816_v49, -inf }
 0x244   :  { %822 = vmax.xlane.f32.xlu0 %v821_v52  ;;  %v1104_v53 = vpop.f32.mrb[15].mxu1 }
 0x2c9   :  { %v820_v54 = vpop.xlane.xlu0 %819 }
 0x2ca   :  { %v824_v55 = vsub.f32 %v815_v43, %v820_v54 }
 0x2cc   :  { %v826_v56 = vmul.f32 1.442695, %v824_v55 }
 0x2ce   :  { %1231 = vpow2.f32 %v826_v56 }
 0x2d1   :  { %v823_v58 = vpop.xlane.xlu0 %822 }
 0x2d2   :  { %v825_v59 = vsub.f32 %v816_v49, %v823_v58 }
 0x2d4   :  { %v828_v60 = vmul.f32 1.442695, %v825_v59 }
 0x2d6   :  { %1233 = vpow2.f32 %v828_v60 }
 0x2d8   :  { %v1232_v61 = vpop.eup %1231 }
 0x2d9   :  { %v830_v62 = vsel %vm817_vm4, %v1232_v61, 0.0 }
 0x2da   :  { %831 = vadd.xlane.f32.xlu1 %v830_v62 }
 0x2e0   :  { %v1234_v63 = vpop.eup %1233 }
 0x2e1   :  { %v833_v0 = vsel %vm817_vm4, %v1234_v63, 0.0 }
 0x2e2   :  { %834 = vadd.xlane.f32.xlu1 %v833_v0 }
 0x367   :  { %v832_v1 = vpop.xlane.xlu1 %831 }
 0x368   :  { %1235 = vrcp.f32 %v832_v1 }
 0x36f   :  { %v835_v2 = vpop.xlane.xlu1 %834 }
 0x370   :  { %1237 = vrcp.f32 %v835_v2 }
 0x372   :  { %v1236_v3 = vpop.eup %1235 }
 0x373   :  { %v838_v4 = vmul.f32 %v1236_v3, %v1232_v61 }
 0x375   :  { %v840_v5 = vpack.c.bf16 %v838_v4, %v838_v4 }
 0x377   :  { %1108 = vmatmul.mubr.msk.bf16.vlgmr.msra.gmra.mrb[16].mxu1 %vm817_vm4, %v840_v5 }
 0x378   :  { %1112 = vmatpush3.bf16.msra.mxu1 %v893_v34  ;;  %1113 = vmatprep.mubr.msk.bf16.mxu1 %vm1317_vm0, %v1316_v57 }
 0x37a   :  { %v1238_v6 = vpop.eup %1237 }
 0x37b   :  { %v839_v7 = vmul.f32 %v1238_v6, %v1234_v63 }
 0x37d   :  { %v841_v8 = vpack.c.bf16 %v839_v7, %v839_v7 }
 0x37f   :  { %1114 = vmatmul.mubr.msk.bf16.vlgmr.msra.gmra.mrb[20].mxu1 %vm817_vm4, %v841_v8 }
 0x44a   :  { %v883_v9 = vpop.f32.mrb[16].mxu1 }
 0x44b   :  { %935 = vst.msk [vmem:[#allocation7] sm:$0xff] %vm715_vm1, %v883_v9  ;;  %v1109_v10 = vpop.f32.mrb[17].mxu1 }
 0x44c   :  { %v886_v11 = vpop.f32.mrb[18].mxu1 }
 0x44d   :  { %v1110_v12 = vpop.f32.mrb[19].mxu1 }
 0x452   :  { %v929_v13 = vpop.f32.mrb[20].mxu1 }
 0x453   :  { %936 = vst.msk [vmem:[#allocation7 + $0x8] sm:$0xff] %vm715_vm1, %v929_v13  ;;  %v1115_v14 = vpop.f32.mrb[21].mxu1 }
 0x454   :  { %v932_v15 = vpop.f32.mrb[22].mxu1 }
 0x455   :  { %1294 = shalt.err (!%p1291_p6)
}
 0x456   :  { %s1295_s10 = scalar_lea.hbm %s1408_s2, 256 }
 0x457   :  { %p1296_p7 = scmp.ne.s32.totalorder %s1408_s2, %s1295_s10  ;;  %p1299_p8 = scmp.lt.u32.totalorder %s1295_s10, %s1408_s2 }
 0x459   :  { %p1301_p9 = pnand %p1299_p8, %p1296_p7 }
 0x45b   :  { %1304 = shalt.err (!%p1301_p9)
}
 0x45c   :  { %s1319_s15 = smov 128   ;;  %s1320_s16 = smov 8   ;;  %v1116_v57 = vpop.f32.mrb[23].mxu1 }
 0x45d   :  { %948 = dma.vmem_to_hbm [thread:$0]  %s943_s6, 256, %s1408_s2, [#allocation4], %s1319_s15, %s1319_s15, %s1320_s16  }
 0x45e   :  { %1309 = dma.done.wait [#allocation4], 256  }
 0x45f   :  { %1310 = vsyncadd [#allocation4], 4294967040 }
 0x460   :  { %952 = vsyncpa [#allocation3], 1 }
 0x461   :  { %953 = vsyncpa [#allocation6], 1 }
 0x462   :  { %954 = vsyncpa [#allocation4], 1 }

</bundles_post_ra>
